<compile_context>
chip_gen: v7x
topology: tpu7x:2x2x1
jax: 0.10.0
libtpu: 0.0.40
codegen_flags: <defaults>
</compile_context>

<pallas_src>
import functools

import jax
import jax.numpy as jnp
from jax.experimental import pallas as pl
from jax.experimental.pallas import tpu as pltpu


BN_EPS = 1e-5
LANE = 128

# Cache: does this jax build accept pl.Buffered(1) (single-buffered weights)?
_SINGLE_BUFFER_OK = None


def _round_up(x, m):
    return ((x + m - 1) // m) * m


def _cdiv(a, b):
    return (a + b - 1) // b


def _vmem_capacity_bytes():
    try:
        info = pltpu.get_tpu_info()
        cap = int(getattr(info, "vmem_capacity_bytes", 0) or 0)
        if cap > 0:
            return cap
    except Exception:
        pass
    return 64 << 20  # conservative (v7x-sized) default if query unavailable


def _pick_tile_rows(n, block_rows):
    """Balanced batch tile, multiple of 16 sublanes (bf16 packing), with at
    least two grid steps when there is enough work (v7x megacore sharding)."""
    align = 16 if n > 8 else 8
    n_tiles = max(1, _cdiv(n, block_rows))
    tb = _round_up(_cdiv(n, n_tiles), align)
    if n > 2 * align and _round_up(n, tb) // tb < 2:
        tb = _round_up(_cdiv(n, 2), align)
    return tb


def _mlp_block_kernel(*refs, n_layers, is_final, out_valid):
    """Runs `n_layers` consecutive (BN-folded) Linear layers on one (TB, C)
    bf16 batch tile.

    refs = (x_tile, [w, b] * n_layers, out_tile).  Weights bf16 (in, out),
    biases f32 (1, out).  Hidden layers: bf16 matmul with f32 accumulate,
    f32 bias + ReLU, stored bf16.  If `is_final`, the last layer produces
    logits, masks the padded lanes to -inf, and applies a numerically stable
    log_softmax in f32.
    """
    x_ref = refs[0]
    out_ref = refs[-1]
    params = refs[1:-1]

    h = x_ref[...]  # bf16 activation tile
    for li in range(n_layers):
        w_ref, b_ref = params[2 * li], params[2 * li + 1]
        y = jnp.dot(h, w_ref[...], preferred_element_type=jnp.float32) + b_ref[...]
        if is_final and li == n_layers - 1:
            lane_idx = jax.lax.broadcasted_iota(jnp.int32, y.shape, dimension=1)
            logits = jnp.where(lane_idx < out_valid, y, -jnp.inf)
            m = jnp.max(logits, axis=-1, keepdims=True)
            shifted = logits - m
            lse = jnp.log(jnp.sum(jnp.exp(shifted), axis=-1, keepdims=True))
            out_ref[...] = (shifted - lse).astype(out_ref.dtype)
        else:
            # ReLU in f32 (safe on v5e, no bf16 VALU), stored bf16 to halve
            # VMEM/spill traffic between layers.
            h = jnp.maximum(y, 0.0).astype(jnp.bfloat16)
            # Dropout: identity in eval mode.
            # TODO(synk): training-mode dropout (pltpu.prng_random_bits mask)
            # and BN batch-statistics update are not implemented.

    if not is_final:
        out_ref[...] = h


def prepare_params(layer_params, last_w, last_b, lane=LANE):
    """One-time parameter prep (outside the hot path): fold eval-mode BN into
    the Linear, transpose W to (in, out), zero-pad feature dims to `lane`
    multiples, cast W to bf16, keep biases f32."""
    folded = []
    for p in layer_params:
        scale = p["gamma"] * jax.lax.rsqrt(p["running_var"] + BN_EPS)
        w = (p["w"] * scale[:, None]).T                      # (in, out), BN folded
        b = (p["b"] - p["running_mean"]) * scale + p["beta"]
        folded.append((w, b))
    folded.append((last_w.T, last_b))

    flat = []
    for w, b in folded:
        d_in, d_out = w.shape
        d_in_p, d_out_p = _round_up(d_in, lane), _round_up(d_out, lane)
        w_p = jnp.zeros((d_in_p, d_out_p), jnp.bfloat16)
        w_p = w_p.at[:d_in, :d_out].set(w.astype(jnp.bfloat16))
        b_p = jnp.zeros((1, d_out_p), jnp.float32)
        b_p = b_p.at[:, :d_out].set(b.astype(jnp.float32))
        flat += [w_p, b_p]
    return flat, int(last_w.shape[0])


def _block_vmem_limit(params_block, tb, d_in_pad, out_pad, out_itemsize,
                      single_buffer, budget):
    wmult = 1 if single_buffer else 2
    weight_bytes = wmult * sum(int(a.size) * a.dtype.itemsize
                               for a in params_block)
    max_w = max([d_in_pad] + [int(a.shape[-1]) for a in params_block[0::2]])
    act_bytes = 2 * tb * d_in_pad * 2                 # double-buffered bf16 x tile
    act_bytes += 2 * tb * out_pad * out_itemsize      # double-buffered out tile
    act_bytes += 3 * tb * max_w * 4                   # f32 y + bf16 h intermediates
    limit = weight_bytes + act_bytes + (2 << 20)      # headroom
    return int(min(budget, max(limit, 8 << 20)))


def _partition_layers(flat_params, tb, budget):
    """Greedily group consecutive layers so each group's (single-buffered)
    resident weights fit the VMEM budget with room for activation tiles."""
    n_layers = len(flat_params) // 2
    widths = [int(flat_params[0].shape[0])] + [
        int(flat_params[2 * i].shape[1]) for i in range(n_layers)]
    max_w = max(widths)
    reserve = 2 * (2 * tb * max_w * 2) + 3 * tb * max_w * 4 + (4 << 20)
    weight_budget = max(budget - reserve, budget // 4)

    groups, cur, cur_bytes = [], [], 0
    for li in range(n_layers):
        w, b = flat_params[2 * li], flat_params[2 * li + 1]
        lb = int(w.size) * w.dtype.itemsize + int(b.size) * b.dtype.itemsize
        if cur and cur_bytes + lb > weight_budget:
            groups.append(cur)
            cur, cur_bytes = [], 0
        # TODO(synk): if a single layer alone exceeds the weight budget, tile
        # it over its output-feature dim with an extra ("arbitrary") grid axis.
        cur.append(li)
        cur_bytes += lb
    groups.append(cur)
    return groups


def _run_block(x_pad, params_block, tb, is_final, out_valid,
               single_buffer_weights, budget):
    n_pad, d_in_pad = x_pad.shape
    n_layers = len(params_block) // 2
    out_pad = int(params_block[-1].shape[1])
    out_dtype = jnp.float32 if is_final else jnp.bfloat16
    out_itemsize = jnp.dtype(out_dtype).itemsize

    kernel = functools.partial(_mlp_block_kernel, n_layers=n_layers,
                               is_final=is_final, out_valid=out_valid)

    # Activation tile streams over the batch; weights/biases stay resident
    # (constant index_map), single-buffered when the build supports it.
    in_specs = [pl.BlockSpec((tb, d_in_pad), lambda i: (i, 0))]
    for arr in params_block:
        if single_buffer_weights:
            spec = pl.BlockSpec(arr.shape, lambda i: (0, 0),
                                pipeline_mode=pl.Buffered(1))
        else:
            spec = pl.BlockSpec(arr.shape, lambda i: (0, 0))
        in_specs.append(spec)

    vmem_limit = _block_vmem_limit(params_block, tb, d_in_pad, out_pad,
                                   out_itemsize, single_buffer_weights, budget)

    return pl.pallas_call(
        kernel,
        out_shape=jax.ShapeDtypeStruct((n_pad, out_pad), out_dtype),
        grid=(n_pad // tb,),
        in_specs=in_specs,
        out_specs=pl.BlockSpec((tb, out_pad), lambda i: (i, 0)),
        compiler_params=pltpu.CompilerParams(
            dimension_semantics=("parallel",),
            vmem_limit_bytes=vmem_limit),
    )(x_pad, *params_block)


def mlp_forward(x, flat_params, out_channels, *, block_rows=None):
    """x: (N, in_channels) f32.  flat_params: output of prepare_params."""
    global _SINGLE_BUFFER_OK

    n, d_in = x.shape
    d_in_pad = int(flat_params[0].shape[0])

    vmem_cap = _vmem_capacity_bytes()
    budget = (vmem_cap * 3) // 4      # leave headroom under physical VMEM
    if block_rows is None:
        # Bigger batch tiles on 128 MiB parts (v5e/v6e); conservative on v7x.
        block_rows = 512 if budget >= (72 << 20) else 256

    tb = _pick_tile_rows(n, block_rows)
    n_pad = _round_up(n, tb)

    # Stream the activations in bf16 (halves the only per-grid-step DMA).
    x_p = jnp.zeros((n_pad, d_in_pad), jnp.bfloat16)
    x_p = x_p.at[:n, :d_in].set(x.astype(jnp.bfloat16))

    groups = _partition_layers(flat_params, tb, budget)

    def run(single_buffer_weights):
        h = x_p
        for gi, layer_ids in enumerate(groups):
            params_block = []
            for li in layer_ids:
                params_block += [flat_params[2 * li], flat_params[2 * li + 1]]
            h = _run_block(h, params_block, tb,
                           is_final=(gi == len(groups) - 1),
                           out_valid=out_channels,
                           single_buffer_weights=single_buffer_weights,
                           budget=budget)
        return h

    candidates = ([True, False] if _SINGLE_BUFFER_OK is None
                  else [_SINGLE_BUFFER_OK])
    last_err = None
    for single in candidates:
        try:
            out = jax.block_until_ready(run(single))
            _SINGLE_BUFFER_OK = single
            return out[:n, :out_channels]
        except Exception as e:   # fallback if pl.Buffered(1) is rejected
            last_err = e
    raise last_err


def init_params(key, in_channels, hidden_channels, out_channels, num_layers):
    """Deterministic synthetic init matching the PyTorch module's shapes."""
    dims = [in_channels] + [hidden_channels] * (num_layers - 1)
    layer_params = []
    for i in range(num_layers - 1):
        d_in, d_out = dims[i], hidden_channels
        key, kw, kb = jax.random.split(key, 3)
        bound = 1.0 / jnp.sqrt(d_in)
        layer_params.append(dict(
            w=jax.random.uniform(kw, (d_out, d_in), jnp.float32, -bound, bound),
            b=jax.random.uniform(kb, (d_out,), jnp.float32, -bound, bound),
            gamma=jnp.ones((d_out,), jnp.float32),
            beta=jnp.zeros((d_out,), jnp.float32),
            running_mean=jnp.zeros((d_out,), jnp.float32),
            running_var=jnp.ones((d_out,), jnp.float32),
        ))
    key, kw, kb = jax.random.split(key, 3)
    bound = 1.0 / jnp.sqrt(hidden_channels)
    last_w = jax.random.uniform(kw, (out_channels, hidden_channels),
                                jnp.float32, -bound, bound)
    last_b = jax.random.uniform(kb, (out_channels,), jnp.float32, -bound, bound)
    return layer_params, last_w, last_b


if __name__ == "__main__":
    in_channels, hidden_channels, out_channels = 16, 32, 8
    num_layers = 3          # -> 2 hidden (Linear+BN+ReLU) blocks + final Linear
    dropout = 0.5           # identity at inference
    batch = 8

    key = jax.random.PRNGKey(0)
    key, kx = jax.random.split(key)
    x = jax.random.normal(kx, (batch, in_channels), jnp.float32)

    layer_params, last_w, last_b = init_params(
        key, in_channels, hidden_channels, out_channels, num_layers)

    flat_params, out_c = prepare_params(layer_params, last_w, last_b)

    out = mlp_forward(x, flat_params, out_c)
    out = jax.block_until_ready(out)
    assert out.shape == (batch, out_channels)

    # Pure-JAX f32 reference with original (unfolded, unpadded) params.
    def ref_forward(xv):
        h = xv
        for p in layer_params:
            h = h @ p["w"].T + p["b"]
            h = ((h - p["running_mean"])
                 * jax.lax.rsqrt(p["running_var"] + BN_EPS)
                 * p["gamma"] + p["beta"])
            h = jnp.maximum(h, 0.0)
        logits = h @ last_w.T + last_b
        return jax.nn.log_softmax(logits, axis=-1)

    ref = ref_forward(x)
    row_sums = jnp.sum(jnp.exp(out), axis=-1)
    assert jnp.allclose(row_sums, 1.0, atol=1e-3), row_sums
    assert jnp.allclose(out, ref, atol=7.5e-2, rtol=7.5e-2), \
        float(jnp.max(jnp.abs(out - ref)))
    print("KERNEL_OK")
</pallas_src>

<mosaic_0001>
module attributes {stable_mosaic.version = 11 : i64} {
  func.func @_mlp_block_kernel(%arg0: i32, %arg1: memref<8x128xbf16, #tpu.memory_space<vmem>>, %arg2: memref<128x128xbf16, #tpu.memory_space<vmem>>, %arg3: memref<1x128xf32, #tpu.memory_space<vmem>>, %arg4: memref<128x128xbf16, #tpu.memory_space<vmem>>, %arg5: memref<1x128xf32, #tpu.memory_space<vmem>>, %arg6: memref<128x128xbf16, #tpu.memory_space<vmem>>, %arg7: memref<1x128xf32, #tpu.memory_space<vmem>>, %arg8: memref<8x128xf32, #tpu.memory_space<vmem>>) attributes {dimension_semantics = [#tpu.dimension_semantics<parallel>], iteration_bounds = array<i64: 1>, scalar_prefetch = 0 : i64, scratch_operands = 0 : i64, tpu.core_type = #tpu.core_type<tc>, window_params = [{transform_indices = @transform_0, window_bounds = array<i64: 8, 128>}, {pipeline_mode = #tpu.pipeline_mode<synchronous>, transform_indices = @transform_1, window_bounds = array<i64: 128, 128>}, {pipeline_mode = #tpu.pipeline_mode<synchronous>, transform_indices = @transform_2, window_bounds = array<i64: 1, 128>}, {pipeline_mode = #tpu.pipeline_mode<synchronous>, transform_indices = @transform_3, window_bounds = array<i64: 128, 128>}, {pipeline_mode = #tpu.pipeline_mode<synchronous>, transform_indices = @transform_4, window_bounds = array<i64: 1, 128>}, {pipeline_mode = #tpu.pipeline_mode<synchronous>, transform_indices = @transform_5, window_bounds = array<i64: 128, 128>}, {pipeline_mode = #tpu.pipeline_mode<synchronous>, transform_indices = @transform_6, window_bounds = array<i64: 1, 128>}, {transform_indices = @transform_7, window_bounds = array<i64: 8, 128>}]} {
    %c0 = arith.constant 0 : index
    %c0_0 = arith.constant 0 : index
    %0 = vector.load %arg1[%c0, %c0_0] : memref<8x128xbf16, #tpu.memory_space<vmem>>, vector<8x128xbf16>
    %c0_1 = arith.constant 0 : index
    %c0_2 = arith.constant 0 : index
    %1 = vector.load %arg2[%c0_1, %c0_2] : memref<128x128xbf16, #tpu.memory_space<vmem>>, vector<128x128xbf16>
    %cst = arith.constant dense<0.000000e+00> : vector<8x128xf32>
    %2 = tpu.matmul %0, %1, %cst {dimension_numbers = #tpu.dot_dimension_numbers<[1], [0], [0], [1], [0, 0, 1, 1], [], []>} : vector<8x128xbf16>, vector<128x128xbf16>, vector<8x128xf32> -> vector<8x128xf32>
    %c0_3 = arith.constant 0 : index
    %c0_4 = arith.constant 0 : index
    %3 = vector.load %arg3[%c0_3, %c0_4] : memref<1x128xf32, #tpu.memory_space<vmem>>, vector<1x128xf32>
    %4 = vector.broadcast %3 : vector<1x128xf32> to vector<8x128xf32>
    %5 = arith.addf %2, %4 : vector<8x128xf32>
    %cst_5 = arith.constant 0.000000e+00 : f32
    %6 = vector.broadcast %cst_5 : f32 to vector<8x128xf32>
    %7 = arith.maximumf %5, %6 : vector<8x128xf32>
    %8 = arith.truncf %7 : vector<8x128xf32> to vector<8x128xbf16>
    %c0_6 = arith.constant 0 : index
    %c0_7 = arith.constant 0 : index
    %9 = vector.load %arg4[%c0_6, %c0_7] : memref<128x128xbf16, #tpu.memory_space<vmem>>, vector<128x128xbf16>
    %cst_8 = arith.constant dense<0.000000e+00> : vector<8x128xf32>
    %10 = tpu.matmul %8, %9, %cst_8 {dimension_numbers = #tpu.dot_dimension_numbers<[1], [0], [0], [1], [0, 0, 1, 1], [], []>} : vector<8x128xbf16>, vector<128x128xbf16>, vector<8x128xf32> -> vector<8x128xf32>
    %c0_9 = arith.constant 0 : index
    %c0_10 = arith.constant 0 : index
    %11 = vector.load %arg5[%c0_9, %c0_10] : memref<1x128xf32, #tpu.memory_space<vmem>>, vector<1x128xf32>
    %12 = vector.broadcast %11 : vector<1x128xf32> to vector<8x128xf32>
    %13 = arith.addf %10, %12 : vector<8x128xf32>
    %cst_11 = arith.constant 0.000000e+00 : f32
    %14 = vector.broadcast %cst_11 : f32 to vector<8x128xf32>
    %15 = arith.maximumf %13, %14 : vector<8x128xf32>
    %16 = arith.truncf %15 : vector<8x128xf32> to vector<8x128xbf16>
    %c0_12 = arith.constant 0 : index
    %c0_13 = arith.constant 0 : index
    %17 = vector.load %arg6[%c0_12, %c0_13] : memref<128x128xbf16, #tpu.memory_space<vmem>>, vector<128x128xbf16>
    %cst_14 = arith.constant dense<0.000000e+00> : vector<8x128xf32>
    %18 = tpu.matmul %16, %17, %cst_14 {dimension_numbers = #tpu.dot_dimension_numbers<[1], [0], [0], [1], [0, 0, 1, 1], [], []>} : vector<8x128xbf16>, vector<128x128xbf16>, vector<8x128xf32> -> vector<8x128xf32>
    %c0_15 = arith.constant 0 : index
    %c0_16 = arith.constant 0 : index
    %19 = vector.load %arg7[%c0_15, %c0_16] : memref<1x128xf32, #tpu.memory_space<vmem>>, vector<1x128xf32>
    %20 = vector.broadcast %19 : vector<1x128xf32> to vector<8x128xf32>
    %21 = arith.addf %18, %20 : vector<8x128xf32>
    %22 = tpu.iota {dimensions = array<i32: 1>} : vector<8x128xi32>
    %c8_i32 = arith.constant 8 : i32
    %23 = vector.broadcast %c8_i32 : i32 to vector<8x128xi32>
    %24 = arith.cmpi slt, %22, %23 : vector<8x128xi32>
    %cst_17 = arith.constant 0xFF800000 : f32
    %25 = vector.broadcast %cst_17 : f32 to vector<8x128xf32>
    %26 = arith.select %24, %21, %25 : vector<8x128xi1>, vector<8x128xf32>
    %cst_18 = arith.constant dense<0xFF800000> : vector<8xf32>
    %27 = vector.multi_reduction <maximumf>, %26, %cst_18 [1] : vector<8x128xf32> to vector<8xf32>
    %28 = vector.shape_cast %27 : vector<8xf32> to vector<8x1xf32>
    %29 = vector.broadcast %28 : vector<8x1xf32> to vector<8x128xf32>
    %30 = arith.subf %26, %29 : vector<8x128xf32>
    %31 = math.exp %30 : vector<8x128xf32>
    %cst_19 = arith.constant dense<0.000000e+00> : vector<8xf32>
    %32 = vector.multi_reduction <add>, %31, %cst_19 [1] : vector<8x128xf32> to vector<8xf32>
    %33 = vector.shape_cast %32 : vector<8xf32> to vector<8x1xf32>
    %34 = math.log %33 : vector<8x1xf32>
    %35 = vector.broadcast %34 : vector<8x1xf32> to vector<8x128xf32>
    %36 = arith.subf %30, %35 : vector<8x128xf32>
    %c0_20 = arith.constant 0 : index
    %c0_21 = arith.constant 0 : index
    %37 = vector.load %arg8[%c0_20, %c0_21] : memref<8x128xf32, #tpu.memory_space<vmem>>, vector<8x128xf32>
    tpu.vector_store %arg8[%c0_20, %c0_21], %36 {strides = array<i32>} : memref<8x128xf32, #tpu.memory_space<vmem>>, vector<8x128xf32>,
    return
  }
  func.func @transform_0(%arg0: i32) -> (i32, i32) {
    %c0_i32 = arith.constant 0 : i32
    %c0_i32_0 = arith.constant 0 : i32
    return %arg0, %c0_i32 : i32, i32
  }
  func.func @transform_1(%arg0: i32) -> (i32, i32) {
    %c0_i32 = arith.constant 0 : i32
    %c0_i32_0 = arith.constant 0 : i32
    %c0_i32_1 = arith.constant 0 : i32
    return %c0_i32, %c0_i32_0 : i32, i32
  }
  func.func @transform_2(%arg0: i32) -> (i32, i32) {
    %c0_i32 = arith.constant 0 : i32
    %c0_i32_0 = arith.constant 0 : i32
    %c0_i32_1 = arith.constant 0 : i32
    return %c0_i32, %c0_i32_0 : i32, i32
  }
  func.func @transform_3(%arg0: i32) -> (i32, i32) {
    %c0_i32 = arith.constant 0 : i32
    %c0_i32_0 = arith.constant 0 : i32
    %c0_i32_1 = arith.constant 0 : i32
    return %c0_i32, %c0_i32_0 : i32, i32
  }
  func.func @transform_4(%arg0: i32) -> (i32, i32) {
    %c0_i32 = arith.constant 0 : i32
    %c0_i32_0 = arith.constant 0 : i32
    %c0_i32_1 = arith.constant 0 : i32
    return %c0_i32, %c0_i32_0 : i32, i32
  }
  func.func @transform_5(%arg0: i32) -> (i32, i32) {
    %c0_i32 = arith.constant 0 : i32
    %c0_i32_0 = arith.constant 0 : i32
    %c0_i32_1 = arith.constant 0 : i32
    return %c0_i32, %c0_i32_0 : i32, i32
  }
  func.func @transform_6(%arg0: i32) -> (i32, i32) {
    %c0_i32 = arith.constant 0 : i32
    %c0_i32_0 = arith.constant 0 : i32
    %c0_i32_1 = arith.constant 0 : i32
    return %c0_i32, %c0_i32_0 : i32, i32
  }
  func.func @transform_7(%arg0: i32) -> (i32, i32) {
    %c0_i32 = arith.constant 0 : i32
    %c0_i32_0 = arith.constant 0 : i32
    return %arg0, %c0_i32 : i32, i32
  }
}

module attributes {stable_mosaic.version = 11 : i64} {
  func.func @_mlp_block_kernel(%arg0: i32, %arg1: memref<8x128xbf16, #tpu.memory_space<vmem>>, %arg2: memref<128x128xbf16, #tpu.memory_space<vmem>>, %arg3: memref<1x128xf32, #tpu.memory_space<vmem>>, %arg4: memref<128x128xbf16, #tpu.memory_space<vmem>>, %arg5: memref<1x128xf32, #tpu.memory_space<vmem>>, %arg6: memref<128x128xbf16, #tpu.memory_space<vmem>>, %arg7: memref<1x128xf32, #tpu.memory_space<vmem>>, %arg8: memref<8x128xf32, #tpu.memory_space<vmem>>) attributes {dimension_semantics = [#tpu.dimension_semantics<parallel>], iteration_bounds = array<i64: 1>, scalar_prefetch = 0 : i64, scratch_operands = 0 : i64, tpu.core_type = #tpu.core_type<tc>, window_params = [{transform_indices = @transform_0, window_bounds = array<i64: 8, 128>}, {pipeline_mode = #tpu.pipeline_mode<synchronous>, transform_indices = @transform_1, window_bounds = array<i64: 128, 128>}, {pipeline_mode = #tpu.pipeline_mode<synchronous>, transform_indices = @transform_2, window_bounds = array<i64: 1, 128>}, {pipeline_mode = #tpu.pipeline_mode<synchronous>, transform_indices = @transform_3, window_bounds = array<i64: 128, 128>}, {pipeline_mode = #tpu.pipeline_mode<synchronous>, transform_indices = @transform_4, window_bounds = array<i64: 1, 128>}, {pipeline_mode = #tpu.pipeline_mode<synchronous>, transform_indices = @transform_5, window_bounds = array<i64: 128, 128>}, {pipeline_mode = #tpu.pipeline_mode<synchronous>, transform_indices = @transform_6, window_bounds = array<i64: 1, 128>}, {transform_indices = @transform_7, window_bounds = array<i64: 8, 128>}]} {
    %c0 = arith.constant 0 : index
    %c0_0 = arith.constant 0 : index
    %0 = vector.load %arg1[%c0, %c0_0] : memref<8x128xbf16, #tpu.memory_space<vmem>>, vector<8x128xbf16>
    %c0_1 = arith.constant 0 : index
    %c0_2 = arith.constant 0 : index
    %1 = vector.load %arg2[%c0_1, %c0_2] : memref<128x128xbf16, #tpu.memory_space<vmem>>, vector<128x128xbf16>
    %cst = arith.constant dense<0.000000e+00> : vector<8x128xf32>
    %2 = tpu.matmul %0, %1, %cst {dimension_numbers = #tpu.dot_dimension_numbers<[1], [0], [0], [1], [0, 0, 1, 1], [], []>} : vector<8x128xbf16>, vector<128x128xbf16>, vector<8x128xf32> -> vector<8x128xf32>
    %c0_3 = arith.constant 0 : index
    %c0_4 = arith.constant 0 : index
    %3 = vector.load %arg3[%c0_3, %c0_4] : memref<1x128xf32, #tpu.memory_space<vmem>>, vector<1x128xf32>
    %4 = vector.broadcast %3 : vector<1x128xf32> to vector<8x128xf32>
    %5 = arith.addf %2, %4 : vector<8x128xf32>
    %cst_5 = arith.constant 0.000000e+00 : f32
    %6 = vector.broadcast %cst_5 : f32 to vector<8x128xf32>
    %7 = arith.maximumf %5, %6 : vector<8x128xf32>
    %8 = arith.truncf %7 : vector<8x128xf32> to vector<8x128xbf16>
    %c0_6 = arith.constant 0 : index
    %c0_7 = arith.constant 0 : index
    %9 = vector.load %arg4[%c0_6, %c0_7] : memref<128x128xbf16, #tpu.memory_space<vmem>>, vector<128x128xbf16>
    %cst_8 = arith.constant dense<0.000000e+00> : vector<8x128xf32>
    %10 = tpu.matmul %8, %9, %cst_8 {dimension_numbers = #tpu.dot_dimension_numbers<[1], [0], [0], [1], [0, 0, 1, 1], [], []>} : vector<8x128xbf16>, vector<128x128xbf16>, vector<8x128xf32> -> vector<8x128xf32>
    %c0_9 = arith.constant 0 : index
    %c0_10 = arith.constant 0 : index
    %11 = vector.load %arg5[%c0_9, %c0_10] : memref<1x128xf32, #tpu.memory_space<vmem>>, vector<1x128xf32>
    %12 = vector.broadcast %11 : vector<1x128xf32> to vector<8x128xf32>
    %13 = arith.addf %10, %12 : vector<8x128xf32>
    %cst_11 = arith.constant 0.000000e+00 : f32
    %14 = vector.broadcast %cst_11 : f32 to vector<8x128xf32>
    %15 = arith.maximumf %13, %14 : vector<8x128xf32>
    %16 = arith.truncf %15 : vector<8x128xf32> to vector<8x128xbf16>
    %c0_12 = arith.constant 0 : index
    %c0_13 = arith.constant 0 : index
    %17 = vector.load %arg6[%c0_12, %c0_13] : memref<128x128xbf16, #tpu.memory_space<vmem>>, vector<128x128xbf16>
    %cst_14 = arith.constant dense<0.000000e+00> : vector<8x128xf32>
    %18 = tpu.matmul %16, %17, %cst_14 {dimension_numbers = #tpu.dot_dimension_numbers<[1], [0], [0], [1], [0, 0, 1, 1], [], []>} : vector<8x128xbf16>, vector<128x128xbf16>, vector<8x128xf32> -> vector<8x128xf32>
    %c0_15 = arith.constant 0 : index
    %c0_16 = arith.constant 0 : index
    %19 = vector.load %arg7[%c0_15, %c0_16] : memref<1x128xf32, #tpu.memory_space<vmem>>, vector<1x128xf32>
    %20 = vector.broadcast %19 : vector<1x128xf32> to vector<8x128xf32>
    %21 = arith.addf %18, %20 : vector<8x128xf32>
    %22 = tpu.iota {dimensions = array<i32: 1>} : vector<8x128xi32>
    %c8_i32 = arith.constant 8 : i32
    %23 = vector.broadcast %c8_i32 : i32 to vector<8x128xi32>
    %24 = arith.cmpi slt, %22, %23 : vector<8x128xi32>
    %cst_17 = arith.constant 0xFF800000 : f32
    %25 = vector.broadcast %cst_17 : f32 to vector<8x128xf32>
    %26 = arith.select %24, %21, %25 : vector<8x128xi1>, vector<8x128xf32>
    %cst_18 = arith.constant dense<0xFF800000> : vector<8xf32>
    %27 = vector.multi_reduction <maximumf>, %26, %cst_18 [1] : vector<8x128xf32> to vector<8xf32>
    %28 = vector.shape_cast %27 : vector<8xf32> to vector<8x1xf32>
    %29 = vector.broadcast %28 : vector<8x1xf32> to vector<8x128xf32>
    %30 = arith.subf %26, %29 : vector<8x128xf32>
    %31 = math.exp %30 : vector<8x128xf32>
    %cst_19 = arith.constant dense<0.000000e+00> : vector<8xf32>
    %32 = vector.multi_reduction <add>, %31, %cst_19 [1] : vector<8x128xf32> to vector<8xf32>
    %33 = vector.shape_cast %32 : vector<8xf32> to vector<8x1xf32>
    %34 = math.log %33 : vector<8x1xf32>
    %35 = vector.broadcast %34 : vector<8x1xf32> to vector<8x128xf32>
    %36 = arith.subf %30, %35 : vector<8x128xf32>
    %c0_20 = arith.constant 0 : index
    %c0_21 = arith.constant 0 : index
    %37 = vector.load %arg8[%c0_20, %c0_21] : memref<8x128xf32, #tpu.memory_space<vmem>>, vector<8x128xf32>
    tpu.vector_store %arg8[%c0_20, %c0_21], %36 {strides = array<i32>} : memref<8x128xf32, #tpu.memory_space<vmem>>, vector<8x128xf32>,
    return
  }
  func.func @transform_0(%arg0: i32) -> (i32, i32) {
    %c0_i32 = arith.constant 0 : i32
    %c0_i32_0 = arith.constant 0 : i32
    return %arg0, %c0_i32 : i32, i32
  }
  func.func @transform_1(%arg0: i32) -> (i32, i32) {
    %c0_i32 = arith.constant 0 : i32
    %c0_i32_0 = arith.constant 0 : i32
    %c0_i32_1 = arith.constant 0 : i32
    return %c0_i32, %c0_i32_0 : i32, i32
  }
  func.func @transform_2(%arg0: i32) -> (i32, i32) {
    %c0_i32 = arith.constant 0 : i32
    %c0_i32_0 = arith.constant 0 : i32
    %c0_i32_1 = arith.constant 0 : i32
    return %c0_i32, %c0_i32_0 : i32, i32
  }
  func.func @transform_3(%arg0: i32) -> (i32, i32) {
    %c0_i32 = arith.constant 0 : i32
    %c0_i32_0 = arith.constant 0 : i32
    %c0_i32_1 = arith.constant 0 : i32
    return %c0_i32, %c0_i32_0 : i32, i32
  }
  func.func @transform_4(%arg0: i32) -> (i32, i32) {
    %c0_i32 = arith.constant 0 : i32
    %c0_i32_0 = arith.constant 0 : i32
    %c0_i32_1 = arith.constant 0 : i32
    return %c0_i32, %c0_i32_0 : i32, i32
  }
  func.func @transform_5(%arg0: i32) -> (i32, i32) {
    %c0_i32 = arith.constant 0 : i32
    %c0_i32_0 = arith.constant 0 : i32
    %c0_i32_1 = arith.constant 0 : i32
    return %c0_i32, %c0_i32_0 : i32, i32
  }
  func.func @transform_6(%arg0: i32) -> (i32, i32) {
    %c0_i32 = arith.constant 0 : i32
    %c0_i32_0 = arith.constant 0 : i32
    %c0_i32_1 = arith.constant 0 : i32
    return %c0_i32, %c0_i32_0 : i32, i32
  }
  func.func @transform_7(%arg0: i32) -> (i32, i32) {
    %c0_i32 = arith.constant 0 : i32
    %c0_i32_0 = arith.constant 0 : i32
    return %arg0, %c0_i32 : i32, i32
  }
}

</mosaic_0001>

<bundles_post_ra>
// kernel: tpu_custom_call.1
= control target key start
LH: loop header
LB: loop body
LE: loop exit
PB: predicated region body
PF: predicated region fallthrough
CT: control target
= control target key end

     0   :  { %12 = vsyncpa [#allocation3], 0  ;;  %s877_s0 = inlined_call_operand.hbm [shape: bf16[8,128], index: 0, kind: input, shape index: {}]   ;;  %s878_s1 = inlined_call_operand.hbm [shape: bf16[128,128], index: 1, kind: input, shape index: {}]   ;;  %s879_s2 = inlined_call_operand.vmem [shape: f32[1,128], index: 2, kind: input, shape index: {}]   ;;  %s880_s3 = inlined_call_operand.hbm [shape: bf16[128,128], index: 3, kind: input, shape index: {}]   ;;  %s881_s4 = inlined_call_operand.vmem [shape: f32[1,128], index: 4, kind: input, shape index: {}]   ;;  %s882_s5 = inlined_call_operand.hbm [shape: bf16[128,128], index: 5, kind: input, shape index: {}]   ;;  %s883_s6 = inlined_call_operand.vmem [shape: f32[1,128], index: 6, kind: input, shape index: {}]   ;;  %s884_s7 = inlined_call_operand.hbm [shape: f32[8,128], index: 7, kind: output, shape index: {}]  }
   0x1   :  { %13 = vsyncpa [#allocation6], 0 }
   0x2   :  { %14 = vsyncpa [#allocation9], 0 }
   0x3   :  { %15 = vsyncpa [#allocation4], 0  ;;  %s720_s24 = smov [#allocation5]   ;;  %s602_s28 = scalar_lea.hbm %s878_s1, 1024 }
   0x4   :  { %s31_s25 = sshll.u32 %s720_s24, 4  ;;  %p603_p0 = scmp.ne.s32.totalorder %s878_s1, %s602_s28  ;;  %s32_s25 = int_to_ptr.vmem [resolvable:$true] %s31_s25 }
   0x5   :  { %p606_p1 = scmp.lt.u32.totalorder %s602_s28, %s878_s1 }
   0x7   :  { %p608_p2 = pnand %p606_p1, %p603_p0 }
   0x9   :  { %611 = shalt.err (!%p608_p2)
}
   0xa   :  { %s612_s10 = scalar_lea.vmem %s32_s25, 1024  ;;  %p617_p4 = scmp.lt.s32.totalorder %s32_s25, %s32_s25 }
   0xb   :  { %p613_p3 = scmp.ne.s32.totalorder %s32_s25, %s612_s10  ;;  %p618_p5 = scmp.lt.s32.totalorder %s612_s10, %s612_s10 }
   0xd   :  { %p619_p6 = por %p618_p5, %p617_p4 }
   0xf   :  { %p620_p7 = pnand %p619_p6, %p613_p3 }
  0x11   :  { %623 = shalt.err (!%p620_p7)
}
  0x12   :  { %s721_s11 = smov 64   ;;  %s722_s12 = smov 4  }
  0x13   :  { %37 = dma.hbm_to_vmem [thread:$0]  %s878_s1, 1024, %s32_s25, [#allocation6], %s721_s11, %s721_s11, %s722_s12  }
  0x14   :  { %s723_s15 = smov [#allocation2]   ;;  %s724_s17 = smov [#allocation7]  }
  0x15   :  { %s22_s16 = sshll.u32 %s723_s15, 4  ;;  %s45_s18 = sshll.u32 %s724_s17, 4  ;;  %s23_s16 = int_to_ptr.vmem [resolvable:$true] %s22_s16  ;;  %s46_s18 = int_to_ptr.vmem [resolvable:$true] %s45_s18 }
  0x16   :  { %s624_s21 = scalar_lea.hbm %s877_s0, 64 }
  0x17   :  { %p625_p8 = scmp.ne.s32.totalorder %s877_s0, %s624_s21  ;;  %p628_p9 = scmp.lt.u32.totalorder %s624_s21, %s877_s0 }
  0x19   :  { %p630_p10 = pnand %p628_p9, %p625_p8 }
  0x1b   :  { %633 = shalt.err (!%p630_p10)
}
  0x1c   :  { %s634_s1 = scalar_lea.vmem %s23_s16, 64  ;;  %p639_p12 = scmp.lt.s32.totalorder %s23_s16, %s23_s16 }
  0x1d   :  { %p635_p11 = scmp.ne.s32.totalorder %s23_s16, %s634_s1  ;;  %p640_p13 = scmp.lt.s32.totalorder %s634_s1, %s634_s1 }
  0x1f   :  { %p641_p0 = por %p640_p13, %p639_p12 }
  0x21   :  { %p642_p1 = pnand %p641_p0, %p635_p11 }
  0x23   :  { %645 = shalt.err (!%p642_p1)
}
  0x24   :  { %25 = dma.hbm_to_vmem [thread:$0]  %s877_s0, 64, %s23_s16, [#allocation3]  }
  0x25   :  { %s646_s30 = scalar_lea.hbm %s880_s3, 1024 }
  0x26   :  { %p647_p2 = scmp.ne.s32.totalorder %s880_s3, %s646_s30  ;;  %p650_p3 = scmp.lt.u32.totalorder %s646_s30, %s880_s3 }
  0x28   :  { %p652_p4 = pnand %p650_p3, %p647_p2 }
  0x2a   :  { %655 = shalt.err (!%p652_p4)
}
  0x2b   :  { %s656_s14 = scalar_lea.vmem %s46_s18, 1024  ;;  %p661_p6 = scmp.lt.s32.totalorder %s46_s18, %s46_s18 }
  0x2c   :  { %p657_p5 = scmp.ne.s32.totalorder %s46_s18, %s656_s14  ;;  %p662_p7 = scmp.lt.s32.totalorder %s656_s14, %s656_s14 }
  0x2e   :  { %p663_p8 = por %p662_p7, %p661_p6 }
  0x30   :  { %p664_p9 = pnand %p663_p8, %p657_p5 }
  0x32   :  { %667 = shalt.err (!%p664_p9)
}
  0x33   :  { %51 = dma.hbm_to_vmem [thread:$0]  %s880_s3, 1024, %s46_s18, [#allocation6], %s721_s11, %s721_s11, %s722_s12  }
  0x34   :  { %s725_s16 = smov [#allocation8]   ;;  %s668_s21 = scalar_lea.hbm %s882_s5, 1024 }
  0x35   :  { %s59_s17 = sshll.u32 %s725_s16, 4  ;;  %p669_p10 = scmp.ne.s32.totalorder %s882_s5, %s668_s21  ;;  %s60_s17 = int_to_ptr.vmem [resolvable:$true] %s59_s17 }
  0x36   :  { %p672_p11 = scmp.lt.u32.totalorder %s668_s21, %s882_s5 }
  0x38   :  { %p674_p12 = pnand %p672_p11, %p669_p10 }
  0x3a   :  { %677 = shalt.err (!%p674_p12)
}
  0x3b   :  { %s678_s1 = scalar_lea.vmem %s60_s17, 1024  ;;  %p683_p0 = scmp.lt.s32.totalorder %s60_s17, %s60_s17 }
  0x3c   :  { %p679_p13 = scmp.ne.s32.totalorder %s60_s17, %s678_s1  ;;  %p684_p1 = scmp.lt.s32.totalorder %s678_s1, %s678_s1 }
  0x3e   :  { %p685_p2 = por %p684_p1, %p683_p0 }
  0x40   :  { %p686_p3 = pnand %p685_p2, %p679_p13 }
  0x42   :  { %689 = shalt.err (!%p686_p3)
}
  0x43   :  { %65 = dma.hbm_to_vmem [thread:$0]  %s882_s5, 1024, %s60_s17, [#allocation9], %s721_s11, %s721_s11, %s722_s12  }
  0x44   :  { %712 = dma.done.wait [#allocation3], 64  }
  0x45   :  { %713 = vsyncadd [#allocation3], 4294967232 }
  0x46   :  { %714 = dma.done.wait [#allocation6], 2048  }
  0x47   :  { %715 = vsyncadd [#allocation6], 4294965248 }
  0x48   :  { %716 = dma.done.wait [#allocation9], 1024  }
  0x49   :  { %717 = vsyncadd [#allocation9], 4294966272  ;;  %v726_v0 = vmov 0.0   ;;  %vm727_vm0 = vmmov 0   ;;  %v574_v1 = vld [vmem:[#allocation5] sm:$0xff]   ;;  %v575_v2 = vld [vmem:[#allocation5 + $0x8] sm:$0xff]   ;;  %v419_v42 = vlaneseq }
  0x4a   :  { %505 = vmatprep.subr.bf16.mxu0 %v726_v0  ;;  %521 = vmatprep.mubr.msk.bf16.mxu0 %vm727_vm0, %v726_v0  ;;  %v576_v3 = vld [vmem:[#allocation5 + $0x10] sm:$0xff]   ;;  %v582_v4 = vld [vmem:[#allocation7] sm:$0xff]   ;;  %v577_v5 = vld [vmem:[#allocation5 + $0x18] sm:$0xff]  }
  0x4b   :  { %525 = vmatprep.subr.bf16.mxu1 %v726_v0  ;;  %541 = vmatprep.mubr.msk.bf16.mxu1 %vm727_vm0, %v726_v0  ;;  %v583_v6 = vld [vmem:[#allocation7 + $0x8] sm:$0xff]   ;;  %v578_v7 = vld [vmem:[#allocation5 + $0x20] sm:$0xff]   ;;  %v584_v8 = vld [vmem:[#allocation7 + $0x10] sm:$0xff]   ;;  %v420_v43 = vand.u32 127, %v419_v42 }
  0x4c   :  { %506 = vmatpush3.bf16.msra.mxu0 %v574_v1  ;;  %526 = vmatpush3.bf16.msra.mxu1 %v582_v4  ;;  %v579_v9 = vld [vmem:[#allocation5 + $0x28] sm:$0xff]   ;;  %v585_v10 = vld [vmem:[#allocation7 + $0x18] sm:$0xff]   ;;  %v580_v11 = vld [vmem:[#allocation5 + $0x30] sm:$0xff]  }
  0x4d   :  { %507 = vmatprep.subr.bf16.mxu0 %v726_v0  ;;  %527 = vmatprep.subr.bf16.mxu1 %v726_v0  ;;  %v586_v12 = vld [vmem:[#allocation7 + $0x20] sm:$0xff]   ;;  %v581_v13 = vld [vmem:[#allocation5 + $0x38] sm:$0xff]   ;;  %v587_v14 = vld [vmem:[#allocation7 + $0x28] sm:$0xff]   ;;  %vm421_vm1 = vcmp.lt.s32.totalorder %v420_v43, 8 }
  0x4e   :  { %v81_v15 = vld [vmem:[#allocation2] sm:$0xf]  ;;  %v588_v16 = vld [vmem:[#allocation7 + $0x30] sm:$0xff]   ;;  %v590_v18 = vld [vmem:[#allocation8] sm:$0xff]  }
  0x4f   :  { %v589_v17 = vld [vmem:[#allocation7 + $0x38] sm:$0xff]   ;;  %v591_v19 = vld [vmem:[#allocation8 + $0x8] sm:$0xff]   ;;  %v592_v20 = vld [vmem:[#allocation8 + $0x10] sm:$0xff]  }
  0x50   :  { %508 = vmatpush3.bf16.msra.mxu0 %v575_v2  ;;  %528 = vmatpush3.bf16.msra.mxu1 %v583_v6  ;;  %v593_v21 = vld [vmem:[#allocation8 + $0x18] sm:$0xff]   ;;  %v594_v22 = vld [vmem:[#allocation8 + $0x20] sm:$0xff]   ;;  %v595_v23 = vld [vmem:[#allocation8 + $0x28] sm:$0xff]  }
  0x51   :  { %509 = vmatprep.subr.bf16.mxu0 %v726_v0  ;;  %529 = vmatprep.subr.bf16.mxu1 %v726_v0  ;;  %v451_v24 = vld [vmem:[%s879_s2] ss:$0 sm:$0xff]  ;;  %v596_v32 = vld [vmem:[#allocation8 + $0x30] sm:$0xff]  }
  0x52   :  { %v597_v33 = vld [vmem:[#allocation8 + $0x38] sm:$0xff]  }
  0x53   :  { %v460_v34 = vld [vmem:[%s881_s4] ss:$0 sm:$0xff]  ;;  %s728_s4 = smov [#allocation10]  }
  0x54   :  { %510 = vmatpush3.bf16.msra.mxu0 %v576_v3  ;;  %530 = vmatpush3.bf16.msra.mxu1 %v584_v8  ;;  %v469_v44 = vld [vmem:[%s883_s6] ss:$0 sm:$0xff]  ;;  %s440_s28 = sshll.u32 %s728_s4, 4  ;;  %s441_s28 = int_to_ptr.vmem [resolvable:$true] %s440_s28 }
  0x55   :  { %511 = vmatprep.subr.bf16.mxu0 %v726_v0  ;;  %531 = vmatprep.subr.bf16.mxu1 %v726_v0  ;;  %s690_s6 = scalar_lea.vmem %s441_s28, 128  ;;  %p695_p5 = scmp.lt.s32.totalorder %s441_s28, %s441_s28 }
  0x56   :  { %p691_p4 = scmp.ne.s32.totalorder %s441_s28, %s690_s6  ;;  %p696_p6 = scmp.lt.s32.totalorder %s690_s6, %s690_s6 }
  0x58   :  { %512 = vmatpush3.bf16.msra.mxu0 %v577_v5  ;;  %532 = vmatpush3.bf16.msra.mxu1 %v585_v10  ;;  %p697_p7 = por %p696_p6, %p695_p5 }
  0x59   :  { %513 = vmatprep.subr.bf16.mxu0 %v726_v0  ;;  %533 = vmatprep.subr.bf16.mxu1 %v726_v0 }
  0x5a   :  { %p698_p8 = pnand %p697_p7, %p691_p4 }
  0x5c   :  { %514 = vmatpush3.bf16.msra.mxu0 %v578_v7  ;;  %534 = vmatpush3.bf16.msra.mxu1 %v586_v12 }
  0x5d   :  { %515 = vmatprep.subr.bf16.mxu0 %v726_v0  ;;  %535 = vmatprep.subr.bf16.mxu1 %v726_v0 }
  0x60   :  { %516 = vmatpush3.bf16.msra.mxu0 %v579_v9  ;;  %536 = vmatpush3.bf16.msra.mxu1 %v587_v14 }
  0x61   :  { %517 = vmatprep.subr.bf16.mxu0 %v726_v0  ;;  %537 = vmatprep.subr.bf16.mxu1 %v726_v0 }
  0x64   :  { %518 = vmatpush3.bf16.msra.mxu0 %v580_v11  ;;  %538 = vmatpush3.bf16.msra.mxu1 %v588_v16 }
  0x65   :  { %519 = vmatprep.subr.bf16.mxu0 %v726_v0  ;;  %539 = vmatprep.subr.bf16.mxu1 %v726_v0 }
  0x68   :  { %520 = vmatpush3.bf16.msra.mxu0 %v581_v13  ;;  %540 = vmatpush3.bf16.msra.mxu1 %v589_v17 }
  0x69   :  { %545 = vmatprep.subr.bf16.mxu0 %v726_v0 }
  0x6b   :  { %522 = vmatmul.mubr.bf16.vlgmr.msra.gmra.mrb[0].mxu0 %v81_v15 }
  0x6c   :  { %561 = vmatprep.mubr.msk.bf16.mxu0 %vm727_vm0, %v726_v0  ;;  %546 = vmatpush3.bf16.msra.mxu0 %v590_v18 }
  0x6d   :  { %547 = vmatprep.subr.bf16.mxu0 %v726_v0 }
  0x70   :  { %548 = vmatpush3.bf16.msra.mxu0 %v591_v19 }
  0x71   :  { %549 = vmatprep.subr.bf16.mxu0 %v726_v0 }
  0x74   :  { %550 = vmatpush3.bf16.msra.mxu0 %v592_v20 }
  0x75   :  { %551 = vmatprep.subr.bf16.mxu0 %v726_v0 }
  0x78   :  { %552 = vmatpush3.bf16.msra.mxu0 %v593_v21 }
  0x79   :  { %553 = vmatprep.subr.bf16.mxu0 %v726_v0 }
  0x7c   :  { %554 = vmatpush3.bf16.msra.mxu0 %v594_v22 }
  0x7d   :  { %555 = vmatprep.subr.bf16.mxu0 %v726_v0 }
  0x80   :  { %556 = vmatpush3.bf16.msra.mxu0 %v595_v23 }
  0x81   :  { %557 = vmatprep.subr.bf16.mxu0 %v726_v0 }
  0x84   :  { %558 = vmatpush3.bf16.msra.mxu0 %v596_v32 }
  0x85   :  { %559 = vmatprep.subr.bf16.mxu0 %v726_v0 }
  0x88   :  { %560 = vmatpush3.bf16.msra.mxu0 %v597_v33 }
 0x13e   :  { %v187_v25 = vpop.f32.mrb[0].mxu0 }
 0x13f   :  { %v188_v26 = vadd.f32 %v451_v24, %v187_v25  ;;  %v523_v27 = vpop.f32.mrb[1].mxu0 }
 0x140   :  { %v190_v28 = vpop.f32.mrb[2].mxu0 }
 0x141   :  { %v193_v29 = vmax.f32 %v188_v26, 0.0  ;;  %v524_v30 = vpop.f32.mrb[3].mxu0 }
 0x143   :  { %v194_v31 = vpack.c.bf16 %v193_v29, %v193_v29 }
 0x145   :  { %542 = vmatmul.mubr.bf16.vlgmr.msra.gmra.mrb[0].mxu1 %v194_v31 }
 0x218   :  { %v300_v35 = vpop.f32.mrb[0].mxu1 }
 0x219   :  { %v301_v36 = vadd.f32 %v460_v34, %v300_v35  ;;  %v543_v37 = vpop.f32.mrb[1].mxu1 }
 0x21a   :  { %v303_v38 = vpop.f32.mrb[2].mxu1 }
 0x21b   :  { %v306_v39 = vmax.f32 %v301_v36, 0.0  ;;  %v544_v40 = vpop.f32.mrb[3].mxu1 }
 0x21d   :  { %v307_v41 = vpack.c.bf16 %v306_v39, %v306_v39 }
 0x21f   :  { %562 = vmatmul.mubr.bf16.vlgmr.msra.gmra.mrb[4].mxu0 %v307_v41 }
 0x2f2   :  { %v413_v45 = vpop.f32.mrb[4].mxu0 }
 0x2f3   :  { %v414_v46 = vadd.f32 %v469_v44, %v413_v45  ;;  %v563_v47 = vpop.f32.mrb[5].mxu0 }
 0x2f4   :  { %v416_v48 = vpop.f32.mrb[6].mxu0 }
 0x2f5   :  { %v564_v49 = vpop.f32.mrb[7].mxu0  ;;  %v422_v50 = vsel %vm421_vm1, %v414_v46, -inf }
 0x2f6   :  { %423 = vmax.xlane.f32.xlu0 %v422_v50 }
 0x383   :  { %v424_v51 = vpop.xlane.xlu0 %423 }
 0x384   :  { %v425_v52 = vsub.f32 %v422_v50, %v424_v51 }
 0x386   :  { %v426_v53 = vmul.f32 1.442695, %v425_v52 }
 0x388   :  { %598 = vpow2.f32 %v426_v53 }
 0x392   :  { %v599_v54 = vpop.eup %598 }
 0x393   :  { %428 = vadd.xlane.f32.xlu0 %v599_v54 }
 0x420   :  { %v429_v55 = vpop.xlane.xlu0 %428 }
 0x421   :  { %600 = vlog2.f32 %v429_v55 }
 0x42b   :  { %v601_v56 = vpop.eup %600 }
 0x42c   :  { %v431_v57 = vmul.f32 0.6931472, %v601_v56 }
 0x42e   :  { %v432_v58 = vsub.f32 %v425_v52, %v431_v57 }
 0x430   :  { %433 = vst [vmem:[#allocation10] sm:$0xff] %v432_v58 }
 0x431   :  { %701 = shalt.err (!%p698_p8)
}
 0x432   :  { %s702_s8 = scalar_lea.hbm %s884_s7, 128 }
 0x433   :  { %p703_p9 = scmp.ne.s32.totalorder %s884_s7, %s702_s8  ;;  %p706_p10 = scmp.lt.u32.totalorder %s702_s8, %s884_s7 }
 0x435   :  { %p708_p11 = pnand %p706_p10, %p703_p9 }
 0x437   :  { %711 = shalt.err (!%p708_p11)
}
 0x438   :  { %443 = dma.vmem_to_hbm [thread:$0]  %s441_s28, 128, %s884_s7, [#allocation4]  }
 0x439   :  { %718 = dma.done.wait [#allocation4], 128  }
 0x43a   :  { %719 = vsyncadd [#allocation4], 4294967168 }
 0x43b   :  { %447 = vsyncpa [#allocation3], 1 }
 0x43c   :  { %448 = vsyncpa [#allocation6], 1 }
 0x43d   :  { %449 = vsyncpa [#allocation9], 1 }
 0x43e   :  { %450 = vsyncpa [#allocation4], 1 }

// kernel: tpu_custom_call.1
= control target key start
LH: loop header
LB: loop body
LE: loop exit
PB: predicated region body
PF: predicated region fallthrough
CT: control target
= control target key end

     0   :  { %12 = vsyncpa [#allocation3], 0  ;;  %s877_s0 = inlined_call_operand.hbm [shape: bf16[8,128], index: 0, kind: input, shape index: {}]   ;;  %s878_s1 = inlined_call_operand.hbm [shape: bf16[128,128], index: 1, kind: input, shape index: {}]   ;;  %s879_s2 = inlined_call_operand.vmem [shape: f32[1,128], index: 2, kind: input, shape index: {}]   ;;  %s880_s3 = inlined_call_operand.hbm [shape: bf16[128,128], index: 3, kind: input, shape index: {}]   ;;  %s881_s4 = inlined_call_operand.vmem [shape: f32[1,128], index: 4, kind: input, shape index: {}]   ;;  %s882_s5 = inlined_call_operand.hbm [shape: bf16[128,128], index: 5, kind: input, shape index: {}]   ;;  %s883_s6 = inlined_call_operand.vmem [shape: f32[1,128], index: 6, kind: input, shape index: {}]   ;;  %s884_s7 = inlined_call_operand.hbm [shape: f32[8,128], index: 7, kind: output, shape index: {}]  }
   0x1   :  { %13 = vsyncpa [#allocation6], 0 }
   0x2   :  { %14 = vsyncpa [#allocation9], 0 }
   0x3   :  { %15 = vsyncpa [#allocation4], 0  ;;  %s720_s24 = smov [#allocation5]   ;;  %s602_s28 = scalar_lea.hbm %s878_s1, 1024 }
   0x4   :  { %s31_s25 = sshll.u32 %s720_s24, 4  ;;  %p603_p0 = scmp.ne.s32.totalorder %s878_s1, %s602_s28  ;;  %s32_s25 = int_to_ptr.vmem [resolvable:$true] %s31_s25 }
   0x5   :  { %p606_p1 = scmp.lt.u32.totalorder %s602_s28, %s878_s1 }
   0x7   :  { %p608_p2 = pnand %p606_p1, %p603_p0 }
   0x9   :  { %611 = shalt.err (!%p608_p2)
}
   0xa   :  { %s612_s10 = scalar_lea.vmem %s32_s25, 1024  ;;  %p617_p4 = scmp.lt.s32.totalorder %s32_s25, %s32_s25 }
   0xb   :  { %p613_p3 = scmp.ne.s32.totalorder %s32_s25, %s612_s10  ;;  %p618_p5 = scmp.lt.s32.totalorder %s612_s10, %s612_s10 }
   0xd   :  { %p619_p6 = por %p618_p5, %p617_p4 }
   0xf   :  { %p620_p7 = pnand %p619_p6, %p613_p3 }
  0x11   :  { %623 = shalt.err (!%p620_p7)
}
  0x12   :  { %s721_s11 = smov 64   ;;  %s722_s12 = smov 4  }
  0x13   :  { %37 = dma.hbm_to_vmem [thread:$0]  %s878_s1, 1024, %s32_s25, [#allocation6], %s721_s11, %s721_s11, %s722_s12  }
  0x14   :  { %s723_s15 = smov [#allocation2]   ;;  %s724_s17 = smov [#allocation7]  }
  0x15   :  { %s22_s16 = sshll.u32 %s723_s15, 4  ;;  %s45_s18 = sshll.u32 %s724_s17, 4  ;;  %s23_s16 = int_to_ptr.vmem [resolvable:$true] %s22_s16  ;;  %s46_s18 = int_to_ptr.vmem [resolvable:$true] %s45_s18 }
  0x16   :  { %s624_s21 = scalar_lea.hbm %s877_s0, 64 }
  0x17   :  { %p625_p8 = scmp.ne.s32.totalorder %s877_s0, %s624_s21  ;;  %p628_p9 = scmp.lt.u32.totalorder %s624_s21, %s877_s0 }
  0x19   :  { %p630_p10 = pnand %p628_p9, %p625_p8 }
  0x1b   :  { %633 = shalt.err (!%p630_p10)
}
  0x1c   :  { %s634_s1 = scalar_lea.vmem %s23_s16, 64  ;;  %p639_p12 = scmp.lt.s32.totalorder %s23_s16, %s23_s16 }
  0x1d   :  { %p635_p11 = scmp.ne.s32.totalorder %s23_s16, %s634_s1  ;;  %p640_p13 = scmp.lt.s32.totalorder %s634_s1, %s634_s1 }
  0x1f   :  { %p641_p0 = por %p640_p13, %p639_p12 }
  0x21   :  { %p642_p1 = pnand %p641_p0, %p635_p11 }
  0x23   :  { %645 = shalt.err (!%p642_p1)
}
  0x24   :  { %25 = dma.hbm_to_vmem [thread:$0]  %s877_s0, 64, %s23_s16, [#allocation3]  }
  0x25   :  { %s646_s30 = scalar_lea.hbm %s880_s3, 1024 }
  0x26   :  { %p647_p2 = scmp.ne.s32.totalorder %s880_s3, %s646_s30  ;;  %p650_p3 = scmp.lt.u32.totalorder %s646_s30, %s880_s3 }
  0x28   :  { %p652_p4 = pnand %p650_p3, %p647_p2 }
  0x2a   :  { %655 = shalt.err (!%p652_p4)
}
  0x2b   :  { %s656_s14 = scalar_lea.vmem %s46_s18, 1024  ;;  %p661_p6 = scmp.lt.s32.totalorder %s46_s18, %s46_s18 }
  0x2c   :  { %p657_p5 = scmp.ne.s32.totalorder %s46_s18, %s656_s14  ;;  %p662_p7 = scmp.lt.s32.totalorder %s656_s14, %s656_s14 }
  0x2e   :  { %p663_p8 = por %p662_p7, %p661_p6 }
  0x30   :  { %p664_p9 = pnand %p663_p8, %p657_p5 }
  0x32   :  { %667 = shalt.err (!%p664_p9)
}
  0x33   :  { %51 = dma.hbm_to_vmem [thread:$0]  %s880_s3, 1024, %s46_s18, [#allocation6], %s721_s11, %s721_s11, %s722_s12  }
  0x34   :  { %s725_s16 = smov [#allocation8]   ;;  %s668_s21 = scalar_lea.hbm %s882_s5, 1024 }
  0x35   :  { %s59_s17 = sshll.u32 %s725_s16, 4  ;;  %p669_p10 = scmp.ne.s32.totalorder %s882_s5, %s668_s21  ;;  %s60_s17 = int_to_ptr.vmem [resolvable:$true] %s59_s17 }
  0x36   :  { %p672_p11 = scmp.lt.u32.totalorder %s668_s21, %s882_s5 }
  0x38   :  { %p674_p12 = pnand %p672_p11, %p669_p10 }
  0x3a   :  { %677 = shalt.err (!%p674_p12)
}
  0x3b   :  { %s678_s1 = scalar_lea.vmem %s60_s17, 1024  ;;  %p683_p0 = scmp.lt.s32.totalorder %s60_s17, %s60_s17 }
  0x3c   :  { %p679_p13 = scmp.ne.s32.totalorder %s60_s17, %s678_s1  ;;  %p684_p1 = scmp.lt.s32.totalorder %s678_s1, %s678_s1 }
  0x3e   :  { %p685_p2 = por %p684_p1, %p683_p0 }
  0x40   :  { %p686_p3 = pnand %p685_p2, %p679_p13 }
  0x42   :  { %689 = shalt.err (!%p686_p3)
}
  0x43   :  { %65 = dma.hbm_to_vmem [thread:$0]  %s882_s5, 1024, %s60_s17, [#allocation9], %s721_s11, %s721_s11, %s722_s12  }
  0x44   :  { %712 = dma.done.wait [#allocation3], 64  }
  0x45   :  { %713 = vsyncadd [#allocation3], 4294967232 }
  0x46   :  { %714 = dma.done.wait [#allocation6], 2048  }
  0x47   :  { %715 = vsyncadd [#allocation6], 4294965248 }
  0x48   :  { %716 = dma.done.wait [#allocation9], 1024  }
  0x49   :  { %717 = vsyncadd [#allocation9], 4294966272  ;;  %v726_v0 = vmov 0.0   ;;  %vm727_vm0 = vmmov 0   ;;  %v574_v1 = vld [vmem:[#allocation5] sm:$0xff]   ;;  %v575_v2 = vld [vmem:[#allocation5 + $0x8] sm:$0xff]   ;;  %v419_v42 = vlaneseq }
  0x4a   :  { %505 = vmatprep.subr.bf16.mxu0 %v726_v0  ;;  %521 = vmatprep.mubr.msk.bf16.mxu0 %vm727_vm0, %v726_v0  ;;  %v576_v3 = vld [vmem:[#allocation5 + $0x10] sm:$0xff]   ;;  %v582_v4 = vld [vmem:[#allocation7] sm:$0xff]   ;;  %v577_v5 = vld [vmem:[#allocation5 + $0x18] sm:$0xff]  }
  0x4b   :  { %525 = vmatprep.subr.bf16.mxu1 %v726_v0  ;;  %541 = vmatprep.mubr.msk.bf16.mxu1 %vm727_vm0, %v726_v0  ;;  %v583_v6 = vld [vmem:[#allocation7 + $0x8] sm:$0xff]   ;;  %v578_v7 = vld [vmem:[#allocation5 + $0x20] sm:$0xff]   ;;  %v584_v8 = vld [vmem:[#allocation7 + $0x10] sm:$0xff]   ;;  %v420_v43 = vand.u32 127, %v419_v42 }
  0x4c   :  { %506 = vmatpush3.bf16.msra.mxu0 %v574_v1  ;;  %526 = vmatpush3.bf16.msra.mxu1 %v582_v4  ;;  %v579_v9 = vld [vmem:[#allocation5 + $0x28] sm:$0xff]   ;;  %v585_v10 = vld [vmem:[#allocation7 + $0x18] sm:$0xff]   ;;  %v580_v11 = vld [vmem:[#allocation5 + $0x30] sm:$0xff]  }
  0x4d   :  { %507 = vmatprep.subr.bf16.mxu0 %v726_v0  ;;  %527 = vmatprep.subr.bf16.mxu1 %v726_v0  ;;  %v586_v12 = vld [vmem:[#allocation7 + $0x20] sm:$0xff]   ;;  %v581_v13 = vld [vmem:[#allocation5 + $0x38] sm:$0xff]   ;;  %v587_v14 = vld [vmem:[#allocation7 + $0x28] sm:$0xff]   ;;  %vm421_vm1 = vcmp.lt.s32.totalorder %v420_v43, 8 }
  0x4e   :  { %v81_v15 = vld [vmem:[#allocation2] sm:$0xf]  ;;  %v588_v16 = vld [vmem:[#allocation7 + $0x30] sm:$0xff]   ;;  %v590_v18 = vld [vmem:[#allocation8] sm:$0xff]  }
  0x4f   :  { %v589_v17 = vld [vmem:[#allocation7 + $0x38] sm:$0xff]   ;;  %v591_v19 = vld [vmem:[#allocation8 + $0x8] sm:$0xff]   ;;  %v592_v20 = vld [vmem:[#allocation8 + $0x10] sm:$0xff]  }
  0x50   :  { %508 = vmatpush3.bf16.msra.mxu0 %v575_v2  ;;  %528 = vmatpush3.bf16.msra.mxu1 %v583_v6  ;;  %v593_v21 = vld [vmem:[#allocation8 + $0x18] sm:$0xff]   ;;  %v594_v22 = vld [vmem:[#allocation8 + $0x20] sm:$0xff]   ;;  %v595_v23 = vld [vmem:[#allocation8 + $0x28] sm:$0xff]  }
  0x51   :  { %509 = vmatprep.subr.bf16.mxu0 %v726_v0  ;;  %529 = vmatprep.subr.bf16.mxu1 %v726_v0  ;;  %v451_v24 = vld [vmem:[%s879_s2] ss:$0 sm:$0xff]  ;;  %v596_v32 = vld [vmem:[#allocation8 + $0x30] sm:$0xff]  }
  0x52   :  { %v597_v33 = vld [vmem:[#allocation8 + $0x38] sm:$0xff]  }
  0x53   :  { %v460_v34 = vld [vmem:[%s881_s4] ss:$0 sm:$0xff]  ;;  %s728_s4 = smov [#allocation10]  }
  0x54   :  { %510 = vmatpush3.bf16.msra.mxu0 %v576_v3  ;;  %530 = vmatpush3.bf16.msra.mxu1 %v584_v8  ;;  %v469_v44 = vld [vmem:[%s883_s6] ss:$0 sm:$0xff]  ;;  %s440_s28 = sshll.u32 %s728_s4, 4  ;;  %s441_s28 = int_to_ptr.vmem [resolvable:$true] %s440_s28 }
  0x55   :  { %511 = vmatprep.subr.bf16.mxu0 %v726_v0  ;;  %531 = vmatprep.subr.bf16.mxu1 %v726_v0  ;;  %s690_s6 = scalar_lea.vmem %s441_s28, 128  ;;  %p695_p5 = scmp.lt.s32.totalorder %s441_s28, %s441_s28 }
  0x56   :  { %p691_p4 = scmp.ne.s32.totalorder %s441_s28, %s690_s6  ;;  %p696_p6 = scmp.lt.s32.totalorder %s690_s6, %s690_s6 }
  0x58   :  { %512 = vmatpush3.bf16.msra.mxu0 %v577_v5  ;;  %532 = vmatpush3.bf16.msra.mxu1 %v585_v10  ;;  %p697_p7 = por %p696_p6, %p695_p5 }
  0x59   :  { %513 = vmatprep.subr.bf16.mxu0 %v726_v0  ;;  %533 = vmatprep.subr.bf16.mxu1 %v726_v0 }
  0x5a   :  { %p698_p8 = pnand %p697_p7, %p691_p4 }
  0x5c   :  { %514 = vmatpush3.bf16.msra.mxu0 %v578_v7  ;;  %534 = vmatpush3.bf16.msra.mxu1 %v586_v12 }
  0x5d   :  { %515 = vmatprep.subr.bf16.mxu0 %v726_v0  ;;  %535 = vmatprep.subr.bf16.mxu1 %v726_v0 }
  0x60   :  { %516 = vmatpush3.bf16.msra.mxu0 %v579_v9  ;;  %536 = vmatpush3.bf16.msra.mxu1 %v587_v14 }
  0x61   :  { %517 = vmatprep.subr.bf16.mxu0 %v726_v0  ;;  %537 = vmatprep.subr.bf16.mxu1 %v726_v0 }
  0x64   :  { %518 = vmatpush3.bf16.msra.mxu0 %v580_v11  ;;  %538 = vmatpush3.bf16.msra.mxu1 %v588_v16 }
  0x65   :  { %519 = vmatprep.subr.bf16.mxu0 %v726_v0  ;;  %539 = vmatprep.subr.bf16.mxu1 %v726_v0 }
  0x68   :  { %520 = vmatpush3.bf16.msra.mxu0 %v581_v13  ;;  %540 = vmatpush3.bf16.msra.mxu1 %v589_v17 }
  0x69   :  { %545 = vmatprep.subr.bf16.mxu0 %v726_v0 }
  0x6b   :  { %522 = vmatmul.mubr.bf16.vlgmr.msra.gmra.mrb[0].mxu0 %v81_v15 }
  0x6c   :  { %561 = vmatprep.mubr.msk.bf16.mxu0 %vm727_vm0, %v726_v0  ;;  %546 = vmatpush3.bf16.msra.mxu0 %v590_v18 }
  0x6d   :  { %547 = vmatprep.subr.bf16.mxu0 %v726_v0 }
  0x70   :  { %548 = vmatpush3.bf16.msra.mxu0 %v591_v19 }
  0x71   :  { %549 = vmatprep.subr.bf16.mxu0 %v726_v0 }
  0x74   :  { %550 = vmatpush3.bf16.msra.mxu0 %v592_v20 }
  0x75   :  { %551 = vmatprep.subr.bf16.mxu0 %v726_v0 }
  0x78   :  { %552 = vmatpush3.bf16.msra.mxu0 %v593_v21 }
  0x79   :  { %553 = vmatprep.subr.bf16.mxu0 %v726_v0 }
  0x7c   :  { %554 = vmatpush3.bf16.msra.mxu0 %v594_v22 }
  0x7d   :  { %555 = vmatprep.subr.bf16.mxu0 %v726_v0 }
  0x80   :  { %556 = vmatpush3.bf16.msra.mxu0 %v595_v23 }
  0x81   :  { %557 = vmatprep.subr.bf16.mxu0 %v726_v0 }
  0x84   :  { %558 = vmatpush3.bf16.msra.mxu0 %v596_v32 }
  0x85   :  { %559 = vmatprep.subr.bf16.mxu0 %v726_v0 }
  0x88   :  { %560 = vmatpush3.bf16.msra.mxu0 %v597_v33 }
 0x13e   :  { %v187_v25 = vpop.f32.mrb[0].mxu0 }
 0x13f   :  { %v188_v26 = vadd.f32 %v451_v24, %v187_v25  ;;  %v523_v27 = vpop.f32.mrb[1].mxu0 }
 0x140   :  { %v190_v28 = vpop.f32.mrb[2].mxu0 }
 0x141   :  { %v193_v29 = vmax.f32 %v188_v26, 0.0  ;;  %v524_v30 = vpop.f32.mrb[3].mxu0 }
 0x143   :  { %v194_v31 = vpack.c.bf16 %v193_v29, %v193_v29 }
 0x145   :  { %542 = vmatmul.mubr.bf16.vlgmr.msra.gmra.mrb[0].mxu1 %v194_v31 }
 0x218   :  { %v300_v35 = vpop.f32.mrb[0].mxu1 }
 0x219   :  { %v301_v36 = vadd.f32 %v460_v34, %v300_v35  ;;  %v543_v37 = vpop.f32.mrb[1].mxu1 }
 0x21a   :  { %v303_v38 = vpop.f32.mrb[2].mxu1 }
 0x21b   :  { %v306_v39 = vmax.f32 %v301_v36, 0.0  ;;  %v544_v40 = vpop.f32.mrb[3].mxu1 }
 0x21d   :  { %v307_v41 = vpack.c.bf16 %v306_v39, %v306_v39 }
 0x21f   :  { %562 = vmatmul.mubr.bf16.vlgmr.msra.gmra.mrb[4].mxu0 %v307_v41 }
 0x2f2   :  { %v413_v45 = vpop.f32.mrb[4].mxu0 }
 0x2f3   :  { %v414_v46 = vadd.f32 %v469_v44, %v413_v45  ;;  %v563_v47 = vpop.f32.mrb[5].mxu0 }
 0x2f4   :  { %v416_v48 = vpop.f32.mrb[6].mxu0 }
 0x2f5   :  { %v564_v49 = vpop.f32.mrb[7].mxu0  ;;  %v422_v50 = vsel %vm421_vm1, %v414_v46, -inf }
 0x2f6   :  { %423 = vmax.xlane.f32.xlu0 %v422_v50 }
 0x383   :  { %v424_v51 = vpop.xlane.xlu0 %423 }
 0x384   :  { %v425_v52 = vsub.f32 %v422_v50, %v424_v51 }
 0x386   :  { %v426_v53 = vmul.f32 1.442695, %v425_v52 }
 0x388   :  { %598 = vpow2.f32 %v426_v53 }
 0x392   :  { %v599_v54 = vpop.eup %598 }
 0x393   :  { %428 = vadd.xlane.f32.xlu0 %v599_v54 }
 0x420   :  { %v429_v55 = vpop.xlane.xlu0 %428 }
 0x421   :  { %600 = vlog2.f32 %v429_v55 }
 0x42b   :  { %v601_v56 = vpop.eup %600 }
 0x42c   :  { %v431_v57 = vmul.f32 0.6931472, %v601_v56 }
 0x42e   :  { %v432_v58 = vsub.f32 %v425_v52, %v431_v57 }
 0x430   :  { %433 = vst [vmem:[#allocation10] sm:$0xff] %v432_v58 }
 0x431   :  { %701 = shalt.err (!%p698_p8)
}
 0x432   :  { %s702_s8 = scalar_lea.hbm %s884_s7, 128 }
 0x433   :  { %p703_p9 = scmp.ne.s32.totalorder %s884_s7, %s702_s8  ;;  %p706_p10 = scmp.lt.u32.totalorder %s702_s8, %s884_s7 }
 0x435   :  { %p708_p11 = pnand %p706_p10, %p703_p9 }
 0x437   :  { %711 = shalt.err (!%p708_p11)
}
 0x438   :  { %443 = dma.vmem_to_hbm [thread:$0]  %s441_s28, 128, %s884_s7, [#allocation4]  }
 0x439   :  { %718 = dma.done.wait [#allocation4], 128  }
 0x43a   :  { %719 = vsyncadd [#allocation4], 4294967168 }
 0x43b   :  { %447 = vsyncpa [#allocation3], 1 }
 0x43c   :  { %448 = vsyncpa [#allocation6], 1 }
 0x43d   :  { %449 = vsyncpa [#allocation9], 1 }
 0x43e   :  { %450 = vsyncpa [#allocation4], 1 }

</bundles_post_ra>
